<compile_context>
chip_gen: v7x
topology: tpu7x:2x2x1
jax: 0.10.0
libtpu: 0.0.40
codegen_flags: <defaults>
</compile_context>

<pallas_src>
import functools
import math

import jax
import jax.numpy as jnp
import numpy as np
from jax.experimental import pallas as pl
from jax.experimental.pallas import tpu as pltpu


# MXU operand dtype (accumulation is always f32). Set to jnp.float32 to
# reproduce the exact f32 PyTorch numerics.
MATMUL_DTYPE = jnp.bfloat16


# ----------------------------- config ---------------------------------------
class Config:
    vocab_size = 128      # multiple of 128 -> lane-dense logits store
    n_embd = 32
    n_layer = 2
    n_head = 4
    block_size = 16


# --------------------------- in-kernel helpers -------------------------------
def _layernorm(x, g, b, eps=1e-5):
    mu = jnp.mean(x, axis=-1, keepdims=True)
    var = jnp.mean((x - mu) ** 2, axis=-1, keepdims=True)
    return (x - mu) * jax.lax.rsqrt(var + eps) * g + b


def _gelu_tanh(x):
    # nn.GELU(approximate='tanh')
    c = math.sqrt(2.0 / math.pi)
    return 0.5 * x * (1.0 + jnp.tanh(c * (x + 0.044715 * x * x * x)))


# ------------------------------ fused kernel ---------------------------------
def gpt_kernel(L, H,
               x_ref,
               ln1g_ref, ln1b_ref, wattn_ref, battn_ref, wproj_ref, bproj_ref,
               ln2g_ref, ln2b_ref, wfc_ref, bfc_ref, wproj2_ref, bproj2_ref,
               lnfg_ref, lnfb_ref, wlm_ref,
               out_ref):
    """Full GPT forward for one sequence (grid step = one batch element)."""
    T, C = x_ref.shape
    Dh = C // H
    scale = jnp.float32(1.0 / math.sqrt(Dh))
    cdt = wattn_ref.dtype                          # MXU operand dtype

    row = jax.lax.broadcasted_iota(jnp.int32, (T, T), 0)
    col = jax.lax.broadcasted_iota(jnp.int32, (T, T), 1)
    causal = (row >= col)[None, :, :]              # (1, T, T)
    neg = jnp.float32(-1e30)                       # finite mask (no inf-inf)

    def mm(a, w):
        # MXU matmul: bf16 (or f32) operands, f32 accumulation.
        return jnp.dot(a.astype(cdt), w.astype(cdt),
                       preferred_element_type=jnp.float32)

    def layer(l, x):
        # ---- causal self-attention ----
        h = _layernorm(x, ln1g_ref[l], ln1b_ref[l])
        qkv = mm(h, wattn_ref[l]) + battn_ref[l]                    # (T, 3C)
        # head-major (H, T, Dh) operands (layout plumbing only)
        q = jnp.stack([qkv[:, 0 * C + hh * Dh: 0 * C + (hh + 1) * Dh]
                       for hh in range(H)], axis=0)
        k = jnp.stack([qkv[:, 1 * C + hh * Dh: 1 * C + (hh + 1) * Dh]
                       for hh in range(H)], axis=0)
        v = jnp.stack([qkv[:, 2 * C + hh * Dh: 2 * C + (hh + 1) * Dh]
                       for hh in range(H)], axis=0)
        # batched over heads: scores, mask, softmax, weighted sum
        s = jnp.einsum("hqd,hkd->hqk", q.astype(cdt), k.astype(cdt),
                       preferred_element_type=jnp.float32) * scale
        s = jnp.where(causal, s, neg)
        s = s - jnp.max(s, axis=-1, keepdims=True)
        p = jnp.exp(s)
        p = p * pl.reciprocal(jnp.sum(p, axis=-1, keepdims=True), approx=True)
        y = jnp.einsum("hqk,hkd->hqd", p.astype(cdt), v.astype(cdt),
                       preferred_element_type=jnp.float32)          # (H, T, Dh)
        y = jnp.concatenate([y[hh] for hh in range(H)], axis=-1)    # (T, C)
        x = x + mm(y, wproj_ref[l]) + bproj_ref[l]

        # ---- MLP ----
        h2 = _layernorm(x, ln2g_ref[l], ln2b_ref[l])
        h2 = mm(h2, wfc_ref[l]) + bfc_ref[l]
        h2 = _gelu_tanh(h2)
        x = x + mm(h2, wproj2_ref[l]) + bproj2_ref[l]
        return x

    # residual stream stays in VMEM/vregs across all L layers
    x = jax.lax.fori_loop(0, L, layer, x_ref[...])

    # final LayerNorm + tied lm_head -> lane-dense (T, vocab) store
    h = _layernorm(x, lnfg_ref[...], lnfb_ref[...])
    out_ref[...] = mm(h, wlm_ref[...])


# ------------------------------ wrapper --------------------------------------
def gpt_forward(idx, params, cfg):
    """Pallas forward. Returns (logits, loss); loss path is not implemented."""
    B, T = idx.shape
    assert T <= cfg.block_size
    C, H, L, V = cfg.n_embd, cfg.n_head, cfg.n_layer, cfg.vocab_size

    # Embedding gathers stay in XLA glue (no clean BlockSpec for a gather).
    tok_emb = jnp.take(params["wte"], idx, axis=0)                  # (B, T, C)
    x = (tok_emb + params["wpe"][:T][None]).astype(jnp.float32)

    weight_args = (
        params["ln1_g"], params["ln1_b"], params["w_attn"], params["b_attn"],
        params["w_proj"], params["b_proj"], params["ln2_g"], params["ln2_b"],
        params["w_fc"], params["b_fc"], params["w_proj2"], params["b_proj2"],
        params["lnf_g"], params["lnf_b"], params["wte_T"],
    )
    # whole (L, ...) weight stacks resident in VMEM for the entire grid
    vmem = pl.BlockSpec(memory_space=pltpu.MemorySpace.VMEM)

    logits = pl.pallas_call(
        functools.partial(gpt_kernel, L, H),
        grid=(B,),
        in_specs=[pl.BlockSpec((None, T, C), lambda b: (b, 0, 0))]
                 + [vmem] * len(weight_args),
        out_specs=pl.BlockSpec((None, T, V), lambda b: (b, 0, 0)),
        out_shape=jax.ShapeDtypeStruct((B, T, V), jnp.float32),
        compiler_params=pltpu.CompilerParams(
            dimension_semantics=("parallel",),   # v7x: one sequence per TC
            vmem_limit_bytes=32 * 1024 * 1024,   # explicit; tiny model fits easily
        ),
    )(x, *weight_args)
    return logits, None


# -------------------------- parameter construction ---------------------------
def init_params(cfg, key):
    """f32 'master' parameters mirroring the PyTorch module layout."""
    C, V, L = cfg.n_embd, cfg.vocab_size, cfg.n_layer
    ks = jax.random.split(key, 2 + 4 * L)
    std = 0.02
    params = {
        "wte": std * jax.random.normal(ks[0], (V, C), jnp.float32),
        "wpe": std * jax.random.normal(ks[1], (cfg.block_size, C), jnp.float32),
        "lnf_g": jnp.ones((1, C), jnp.float32),
        "lnf_b": jnp.zeros((1, C), jnp.float32),
        "blocks": [],
    }
    for l in range(L):
        k = ks[2 + 4 * l: 2 + 4 * (l + 1)]
        params["blocks"].append({
            "ln1_g": jnp.ones((1, C), jnp.float32),
            "ln1_b": jnp.zeros((1, C), jnp.float32),
            "w_attn": std * jax.random.normal(k[0], (C, 3 * C), jnp.float32),
            "b_attn": jnp.zeros((1, 3 * C), jnp.float32),
            "w_proj": std * jax.random.normal(k[1], (C, C), jnp.float32),
            "b_proj": jnp.zeros((1, C), jnp.float32),
            "ln2_g": jnp.ones((1, C), jnp.float32),
            "ln2_b": jnp.zeros((1, C), jnp.float32),
            "w_fc": std * jax.random.normal(k[2], (C, 4 * C), jnp.float32),
            "b_fc": jnp.zeros((1, 4 * C), jnp.float32),
            "w_proj2": std * jax.random.normal(k[3], (4 * C, C), jnp.float32),
            "b_proj2": jnp.zeros((1, C), jnp.float32),
        })
    return params


def pack_params(p, matmul_dtype):
    """Stack per-layer weights to (L, ...), cast MXU operands, precompute wte.T."""
    def stack(name):
        return jnp.stack([blk[name] for blk in p["blocks"]], axis=0)
    wd = matmul_dtype
    return {
        "wte": p["wte"],                        # f32: embedding gather stays exact
        "wpe": p["wpe"],
        "wte_T": p["wte"].T.astype(wd),         # (C, V) tied lm_head, built once
        "lnf_g": p["lnf_g"], "lnf_b": p["lnf_b"],
        "ln1_g": stack("ln1_g"), "ln1_b": stack("ln1_b"),
        "w_attn": stack("w_attn").astype(wd), "b_attn": stack("b_attn"),
        "w_proj": stack("w_proj").astype(wd), "b_proj": stack("b_proj"),
        "ln2_g": stack("ln2_g"), "ln2_b": stack("ln2_b"),
        "w_fc": stack("w_fc").astype(wd), "b_fc": stack("b_fc"),
        "w_proj2": stack("w_proj2").astype(wd), "b_proj2": stack("b_proj2"),
    }


# --------------------------- pure-JAX reference -------------------------------
def gpt_forward_ref(idx, params, cfg, matmul_dtype=jnp.float32):
    """Reference mirroring the PyTorch module. matmul_dtype controls the
    precision of the MXU operand casts (f32 => exact module semantics)."""
    B, T = idx.shape
    C, H = cfg.n_embd, cfg.n_head
    Dh = C // H

    def mm(a, b):
        return jnp.dot(a.astype(matmul_dtype), b.astype(matmul_dtype),
                       preferred_element_type=jnp.float32)

    def ln(x, g, b, eps=1e-5):
        mu = x.mean(-1, keepdims=True)
        var = ((x - mu) ** 2).mean(-1, keepdims=True)
        return (x - mu) * jax.lax.rsqrt(var + eps) * g + b

    x = jnp.take(params["wte"], idx, axis=0) + params["wpe"][:T][None]
    mask = jnp.tril(jnp.ones((T, T), bool))
    for p in params["blocks"]:
        h = ln(x, p["ln1_g"], p["ln1_b"])
        qkv = mm(h, p["w_attn"]) + p["b_attn"]
        q, k, v = jnp.split(qkv, 3, axis=-1)
        q = q.reshape(B, T, H, Dh).transpose(0, 2, 1, 3)
        k = k.reshape(B, T, H, Dh).transpose(0, 2, 1, 3)
        v = v.reshape(B, T, H, Dh).transpose(0, 2, 1, 3)
        att = jnp.einsum("bhqd,bhkd->bhqk", q.astype(matmul_dtype),
                         k.astype(matmul_dtype),
                         preferred_element_type=jnp.float32) * (1.0 / math.sqrt(Dh))
        att = jnp.where(mask, att, -1e30)
        att = att - att.max(-1, keepdims=True)
        patt = jnp.exp(att)
        patt = patt / patt.sum(-1, keepdims=True)
        y = jnp.einsum("bhqk,bhkd->bhqd", patt.astype(matmul_dtype),
                       v.astype(matmul_dtype),
                       preferred_element_type=jnp.float32)
        y = y.transpose(0, 2, 1, 3).reshape(B, T, C)
        x = x + mm(y, p["w_proj"]) + p["b_proj"]
        h = ln(x, p["ln2_g"], p["ln2_b"])
        h = mm(h, p["w_fc"]) + p["b_fc"]
        h = 0.5 * h * (1.0 + jnp.tanh(math.sqrt(2.0 / math.pi)
                                      * (h + 0.044715 * h ** 3)))
        x = x + mm(h, p["w_proj2"]) + p["b_proj2"]
    x = ln(x, params["lnf_g"], params["lnf_b"])
    return mm(x, params["wte"].T)


# --------------------------------- main ---------------------------------------
if __name__ == "__main__":
    cfg = Config()
    B, T = 2, 8

    key = jax.random.PRNGKey(0)
    pkey, ikey = jax.random.split(key)
    ref_params = init_params(cfg, pkey)
    params = pack_params(ref_params, MATMUL_DTYPE)
    idx = jax.random.randint(ikey, (B, T), 0, cfg.vocab_size, dtype=jnp.int32)

    logits, loss = gpt_forward(idx, params, cfg)
    logits = jax.block_until_ready(logits)
    assert logits.shape == (B, T, cfg.vocab_size)

    # Tight check vs a reference with identical matmul-operand precision.
    ref_mixed = gpt_forward_ref(idx, ref_params, cfg, matmul_dtype=MATMUL_DTYPE)
    np.testing.assert_allclose(np.asarray(logits), np.asarray(ref_mixed),
                               rtol=5e-3, atol=2e-3)

    # Loose check vs exact f32 module semantics (difference = bf16 rounding).
    ref_f32 = gpt_forward_ref(idx, ref_params, cfg, matmul_dtype=jnp.float32)
    np.testing.assert_allclose(np.asarray(logits), np.asarray(ref_f32),
                               rtol=3e-2, atol=3e-2)

    print("KERNEL_OK")
</pallas_src>

<mosaic_0001>
module attributes {stable_mosaic.version = 11 : i64} {
  func.func @gpt_kernel(%arg0: i32, %arg1: memref<1x8x32xf32, #tpu.memory_space<vmem>>, %arg2: memref<2x1x32xf32, #tpu.memory_space<vmem>>, %arg3: memref<2x1x32xf32, #tpu.memory_space<vmem>>, %arg4: memref<2x32x96xbf16, #tpu.memory_space<vmem>>, %arg5: memref<2x1x96xf32, #tpu.memory_space<vmem>>, %arg6: memref<2x32x32xbf16, #tpu.memory_space<vmem>>, %arg7: memref<2x1x32xf32, #tpu.memory_space<vmem>>, %arg8: memref<2x1x32xf32, #tpu.memory_space<vmem>>, %arg9: memref<2x1x32xf32, #tpu.memory_space<vmem>>, %arg10: memref<2x32x128xbf16, #tpu.memory_space<vmem>>, %arg11: memref<2x1x128xf32, #tpu.memory_space<vmem>>, %arg12: memref<2x128x32xbf16, #tpu.memory_space<vmem>>, %arg13: memref<2x1x32xf32, #tpu.memory_space<vmem>>, %arg14: memref<1x32xf32, #tpu.memory_space<vmem>>, %arg15: memref<1x32xf32, #tpu.memory_space<vmem>>, %arg16: memref<32x128xbf16, #tpu.memory_space<vmem>>, %arg17: memref<1x8x128xf32, #tpu.memory_space<vmem>>) attributes {dimension_semantics = [#tpu.dimension_semantics<parallel>], iteration_bounds = array<i64: 2>, scalar_prefetch = 0 : i64, scratch_operands = 0 : i64, tpu.core_type = #tpu.core_type<tc>, window_params = [{transform_indices = @transform_0, window_bounds = array<i64: 1, 8, 32>}, {pipeline_mode = #tpu.pipeline_mode<synchronous>, transform_indices = @transform_1, window_bounds = array<i64: 2, 1, 32>}, {pipeline_mode = #tpu.pipeline_mode<synchronous>, transform_indices = @transform_2, window_bounds = array<i64: 2, 1, 32>}, {pipeline_mode = #tpu.pipeline_mode<synchronous>, transform_indices = @transform_3, window_bounds = array<i64: 2, 32, 96>}, {pipeline_mode = #tpu.pipeline_mode<synchronous>, transform_indices = @transform_4, window_bounds = array<i64: 2, 1, 96>}, {pipeline_mode = #tpu.pipeline_mode<synchronous>, transform_indices = @transform_5, window_bounds = array<i64: 2, 32, 32>}, {pipeline_mode = #tpu.pipeline_mode<synchronous>, transform_indices = @transform_6, window_bounds = array<i64: 2, 1, 32>}, {pipeline_mode = #tpu.pipeline_mode<synchronous>, transform_indices = @transform_7, window_bounds = array<i64: 2, 1, 32>}, {pipeline_mode = #tpu.pipeline_mode<synchronous>, transform_indices = @transform_8, window_bounds = array<i64: 2, 1, 32>}, {pipeline_mode = #tpu.pipeline_mode<synchronous>, transform_indices = @transform_9, window_bounds = array<i64: 2, 32, 128>}, {pipeline_mode = #tpu.pipeline_mode<synchronous>, transform_indices = @transform_10, window_bounds = array<i64: 2, 1, 128>}, {pipeline_mode = #tpu.pipeline_mode<synchronous>, transform_indices = @transform_11, window_bounds = array<i64: 2, 128, 32>}, {pipeline_mode = #tpu.pipeline_mode<synchronous>, transform_indices = @transform_12, window_bounds = array<i64: 2, 1, 32>}, {pipeline_mode = #tpu.pipeline_mode<synchronous>, transform_indices = @transform_13, window_bounds = array<i64: 1, 32>}, {pipeline_mode = #tpu.pipeline_mode<synchronous>, transform_indices = @transform_14, window_bounds = array<i64: 1, 32>}, {pipeline_mode = #tpu.pipeline_mode<synchronous>, transform_indices = @transform_15, window_bounds = array<i64: 32, 128>}, {transform_indices = @transform_16, window_bounds = array<i64: 1, 8, 128>}]} {
    %0 = tpu.iota {dimensions = array<i32: 0>} : vector<8x8xi32>
    %1 = tpu.iota {dimensions = array<i32: 1>} : vector<8x8xi32>
    %2 = arith.cmpi sge, %0, %1 : vector<8x8xi32>
    %3 = vector.shape_cast %2 : vector<8x8xi1> to vector<1x8x8xi1>
    %c0 = arith.constant 0 : index
    %c0_0 = arith.constant 0 : index
    %c0_1 = arith.constant 0 : index
    %4 = vector.load %arg1[%c0, %c0_0, %c0_1] : memref<1x8x32xf32, #tpu.memory_space<vmem>>, vector<1x8x32xf32>
    %5 = vector.shape_cast %4 : vector<1x8x32xf32> to vector<8x32xf32>
    %cst = arith.constant 0.353553385 : f32
    %cst_2 = arith.constant -1.000000e+30 : f32
    %c0_i32 = arith.constant 0 : i32
    %c2_i32 = arith.constant 2 : i32
    %6 = arith.addi %c0_i32, %c2_i32 : i32
    %c1_i32 = arith.constant 1 : i32
    %7 = scf.for %arg18 = %c0_i32 to %6 step %c1_i32 iter_args(%arg19 = %5) -> (vector<8x32xf32>)  : i32 {
      %38 = arith.index_cast %arg18 : i32 to index
      %c0_19 = arith.constant 0 : index
      %c0_20 = arith.constant 0 : index
      %39 = vector.load %arg2[%38, %c0_19, %c0_20] : memref<2x1x32xf32, #tpu.memory_space<vmem>>, vector<1x1x32xf32>
      %40 = vector.shape_cast %39 : vector<1x1x32xf32> to vector<1x32xf32>
      %41 = arith.index_cast %arg18 : i32 to index
      %c0_21 = arith.constant 0 : index
      %c0_22 = arith.constant 0 : index
      %42 = vector.load %arg3[%41, %c0_21, %c0_22] : memref<2x1x32xf32, #tpu.memory_space<vmem>>, vector<1x1x32xf32>
      %43 = vector.shape_cast %42 : vector<1x1x32xf32> to vector<1x32xf32>
      %cst_23 = arith.constant dense<0.000000e+00> : vector<8xf32>
      %44 = vector.multi_reduction <add>, %arg19, %cst_23 [1] : vector<8x32xf32> to vector<8xf32>
      %45 = vector.shape_cast %44 : vector<8xf32> to vector<8x1xf32>
      %cst_24 = arith.constant 3.200000e+01 : f32
      %46 = vector.broadcast %cst_24 : f32 to vector<8x1xf32>
      %47 = arith.divf %45, %46 : vector<8x1xf32>
      %48 = vector.broadcast %47 : vector<8x1xf32> to vector<8x32xf32>
      %49 = arith.subf %arg19, %48 : vector<8x32xf32>
      %50 = arith.mulf %49, %49 : vector<8x32xf32>
      %cst_25 = arith.constant dense<0.000000e+00> : vector<8xf32>
      %51 = vector.multi_reduction <add>, %50, %cst_25 [1] : vector<8x32xf32> to vector<8xf32>
      %52 = vector.shape_cast %51 : vector<8xf32> to vector<8x1xf32>
      %cst_26 = arith.constant 3.200000e+01 : f32
      %53 = vector.broadcast %cst_26 : f32 to vector<8x1xf32>
      %54 = arith.divf %52, %53 : vector<8x1xf32>
      %55 = vector.broadcast %47 : vector<8x1xf32> to vector<8x32xf32>
      %56 = arith.subf %arg19, %55 : vector<8x32xf32>
      %cst_27 = arith.constant 9.99999974E-6 : f32
      %57 = vector.broadcast %cst_27 : f32 to vector<8x1xf32>
      %58 = arith.addf %54, %57 : vector<8x1xf32>
      %59 = math.rsqrt %58 : vector<8x1xf32>
      %60 = vector.broadcast %59 : vector<8x1xf32> to vector<8x32xf32>
      %61 = arith.mulf %56, %60 : vector<8x32xf32>
      %62 = vector.broadcast %40 : vector<1x32xf32> to vector<8x32xf32>
      %63 = arith.mulf %61, %62 : vector<8x32xf32>
      %64 = vector.broadcast %43 : vector<1x32xf32> to vector<8x32xf32>
      %65 = arith.addf %63, %64 : vector<8x32xf32>
      %66 = arith.index_cast %arg18 : i32 to index
      %c0_28 = arith.constant 0 : index
      %c0_29 = arith.constant 0 : index
      %67 = vector.load %arg4[%66, %c0_28, %c0_29] : memref<2x32x96xbf16, #tpu.memory_space<vmem>>, vector<1x32x96xbf16>
      %68 = vector.shape_cast %67 : vector<1x32x96xbf16> to vector<32x96xbf16>
      %69 = arith.truncf %65 : vector<8x32xf32> to vector<8x32xbf16>
      %cst_30 = arith.constant dense<0.000000e+00> : vector<8x96xf32>
      %70 = tpu.matmul %69, %68, %cst_30 {dimension_numbers = #tpu.dot_dimension_numbers<[1], [0], [0], [1], [0, 0, 1, 1], [], []>} : vector<8x32xbf16>, vector<32x96xbf16>, vector<8x96xf32> -> vector<8x96xf32>
      %71 = arith.index_cast %arg18 : i32 to index
      %c0_31 = arith.constant 0 : index
      %c0_32 = arith.constant 0 : index
      %72 = vector.load %arg5[%71, %c0_31, %c0_32] : memref<2x1x96xf32, #tpu.memory_space<vmem>>, vector<1x1x96xf32>
      %73 = vector.shape_cast %72 : vector<1x1x96xf32> to vector<1x96xf32>
      %74 = vector.broadcast %73 : vector<1x96xf32> to vector<8x96xf32>
      %75 = arith.addf %70, %74 : vector<8x96xf32>
      %76 = vector.extract_strided_slice %75 {offsets = [0, 0], sizes = [8, 8], strides = [1, 1]} : vector<8x96xf32> to vector<8x8xf32>
      %77 = vector.extract_strided_slice %75 {offsets = [0, 8], sizes = [8, 8], strides = [1, 1]} : vector<8x96xf32> to vector<8x8xf32>
      %78 = vector.extract_strided_slice %75 {offsets = [0, 16], sizes = [8, 8], strides = [1, 1]} : vector<8x96xf32> to vector<8x8xf32>
      %79 = vector.extract_strided_slice %75 {offsets = [0, 24], sizes = [8, 8], strides = [1, 1]} : vector<8x96xf32> to vector<8x8xf32>
      %80 = vector.shape_cast %76 : vector<8x8xf32> to vector<1x8x8xf32>
      %81 = vector.shape_cast %77 : vector<8x8xf32> to vector<1x8x8xf32>
      %82 = vector.shape_cast %78 : vector<8x8xf32> to vector<1x8x8xf32>
      %83 = vector.shape_cast %79 : vector<8x8xf32> to vector<1x8x8xf32>
      %84 = tpu.concatenate %80, %81, %82, %83 in 0 : vector<1x8x8xf32>, vector<1x8x8xf32>, vector<1x8x8xf32>, vector<1x8x8xf32> -> vector<4x8x8xf32>
      %85 = vector.extract_strided_slice %75 {offsets = [0, 32], sizes = [8, 8], strides = [1, 1]} : vector<8x96xf32> to vector<8x8xf32>
      %86 = vector.extract_strided_slice %75 {offsets = [0, 40], sizes = [8, 8], strides = [1, 1]} : vector<8x96xf32> to vector<8x8xf32>
      %87 = vector.extract_strided_slice %75 {offsets = [0, 48], sizes = [8, 8], strides = [1, 1]} : vector<8x96xf32> to vector<8x8xf32>
      %88 = vector.extract_strided_slice %75 {offsets = [0, 56], sizes = [8, 8], strides = [1, 1]} : vector<8x96xf32> to vector<8x8xf32>
      %89 = vector.shape_cast %85 : vector<8x8xf32> to vector<1x8x8xf32>
      %90 = vector.shape_cast %86 : vector<8x8xf32> to vector<1x8x8xf32>
      %91 = vector.shape_cast %87 : vector<8x8xf32> to vector<1x8x8xf32>
      %92 = vector.shape_cast %88 : vector<8x8xf32> to vector<1x8x8xf32>
      %93 = tpu.concatenate %89, %90, %91, %92 in 0 : vector<1x8x8xf32>, vector<1x8x8xf32>, vector<1x8x8xf32>, vector<1x8x8xf32> -> vector<4x8x8xf32>
      %94 = vector.extract_strided_slice %75 {offsets = [0, 64], sizes = [8, 8], strides = [1, 1]} : vector<8x96xf32> to vector<8x8xf32>
      %95 = vector.extract_strided_slice %75 {offsets = [0, 72], sizes = [8, 8], strides = [1, 1]} : vector<8x96xf32> to vector<8x8xf32>
      %96 = vector.extract_strided_slice %75 {offsets = [0, 80], sizes = [8, 8], strides = [1, 1]} : vector<8x96xf32> to vector<8x8xf32>
      %97 = vector.extract_strided_slice %75 {offsets = [0, 88], sizes = [8, 8], strides = [1, 1]} : vector<8x96xf32> to vector<8x8xf32>
      %98 = vector.shape_cast %94 : vector<8x8xf32> to vector<1x8x8xf32>
      %99 = vector.shape_cast %95 : vector<8x8xf32> to vector<1x8x8xf32>
      %100 = vector.shape_cast %96 : vector<8x8xf32> to vector<1x8x8xf32>
      %101 = vector.shape_cast %97 : vector<8x8xf32> to vector<1x8x8xf32>
      %102 = tpu.concatenate %98, %99, %100, %101 in 0 : vector<1x8x8xf32>, vector<1x8x8xf32>, vector<1x8x8xf32>, vector<1x8x8xf32> -> vector<4x8x8xf32>
      %103 = arith.truncf %84 : vector<4x8x8xf32> to vector<4x8x8xbf16>
      %104 = arith.truncf %93 : vector<4x8x8xf32> to vector<4x8x8xbf16>
      "tpu.trace_start"() <{level = 10 : i32, message = "hqd,hkd->hqk"}> : () -> ()
      %cst_33 = arith.constant dense<0.000000e+00> : vector<4x8x8xf32>
      %105 = tpu.matmul %103, %104, %cst_33 {dimension_numbers = #tpu.dot_dimension_numbers<[2], [2], [1], [1], [0, 0, 0, 1, 1, 1], [0], [0]>} : vector<4x8x8xbf16>, vector<4x8x8xbf16>, vector<4x8x8xf32> -> vector<4x8x8xf32>
      "tpu.trace_stop"() : () -> ()
      %106 = vector.broadcast %cst : f32 to vector<4x8x8xf32>
      %107 = arith.mulf %105, %106 : vector<4x8x8xf32>
      %108 = vector.shape_cast %3 : vector<1x8x8xi1> to vector<1x8x8xi1>
      %109 = vector.broadcast %108 : vector<1x8x8xi1> to vector<4x8x8xi1>
      %110 = vector.broadcast %cst_2 : f32 to vector<4x8x8xf32>
      %111 = arith.select %109, %107, %110 : vector<4x8x8xi1>, vector<4x8x8xf32>
      %cst_34 = arith.constant dense<0xFF800000> : vector<4x8xf32>
      %112 = vector.multi_reduction <maximumf>, %111, %cst_34 [2] : vector<4x8x8xf32> to vector<4x8xf32>
      %113 = vector.shape_cast %112 : vector<4x8xf32> to vector<4x8x1xf32>
      %114 = vector.broadcast %113 : vector<4x8x1xf32> to vector<4x8x8xf32>
      %115 = arith.subf %111, %114 : vector<4x8x8xf32>
      %116 = math.exp %115 : vector<4x8x8xf32>
      %cst_35 = arith.constant dense<0.000000e+00> : vector<4x8xf32>
      %117 = vector.multi_reduction <add>, %116, %cst_35 [2] : vector<4x8x8xf32> to vector<4x8xf32>
      %118 = vector.shape_cast %117 : vector<4x8xf32> to vector<4x8x1xf32>
      %119 = tpu.reciprocal %118 {approx = true} : vector<4x8x1xf32> -> vector<4x8x1xf32>
      %120 = vector.broadcast %119 : vector<4x8x1xf32> to vector<4x8x8xf32>
      %121 = arith.mulf %116, %120 : vector<4x8x8xf32>
      %122 = arith.truncf %121 : vector<4x8x8xf32> to vector<4x8x8xbf16>
      %123 = arith.truncf %102 : vector<4x8x8xf32> to vector<4x8x8xbf16>
      "tpu.trace_start"() <{level = 10 : i32, message = "hqk,hkd->hqd"}> : () -> ()
      %cst_36 = arith.constant dense<0.000000e+00> : vector<4x8x8xf32>
      %124 = tpu.matmul %122, %123, %cst_36 {dimension_numbers = #tpu.dot_dimension_numbers<[2], [1], [1], [2], [0, 0, 0, 1, 1, 2], [0], [0]>} : vector<4x8x8xbf16>, vector<4x8x8xbf16>, vector<4x8x8xf32> -> vector<4x8x8xf32>
      "tpu.trace_stop"() : () -> ()
      %125 = vector.extract_strided_slice %124 {offsets = [0, 0, 0], sizes = [1, 8, 8], strides = [1, 1, 1]} : vector<4x8x8xf32> to vector<1x8x8xf32>
      %126 = vector.shape_cast %125 : vector<1x8x8xf32> to vector<8x8xf32>
      %127 = vector.extract_strided_slice %124 {offsets = [1, 0, 0], sizes = [1, 8, 8], strides = [1, 1, 1]} : vector<4x8x8xf32> to vector<1x8x8xf32>
      %128 = vector.shape_cast %127 : vector<1x8x8xf32> to vector<8x8xf32>
      %129 = vector.extract_strided_slice %124 {offsets = [2, 0, 0], sizes = [1, 8, 8], strides = [1, 1, 1]} : vector<4x8x8xf32> to vector<1x8x8xf32>
      %130 = vector.shape_cast %129 : vector<1x8x8xf32> to vector<8x8xf32>
      %131 = vector.extract_strided_slice %124 {offsets = [3, 0, 0], sizes = [1, 8, 8], strides = [1, 1, 1]} : vector<4x8x8xf32> to vector<1x8x8xf32>
      %132 = vector.shape_cast %131 : vector<1x8x8xf32> to vector<8x8xf32>
      %133 = tpu.concatenate %126, %128, %130, %132 in 1 : vector<8x8xf32>, vector<8x8xf32>, vector<8x8xf32>, vector<8x8xf32> -> vector<8x32xf32>
      %134 = arith.index_cast %arg18 : i32 to index
      %c0_37 = arith.constant 0 : index
      %c0_38 = arith.constant 0 : index
      %135 = vector.load %arg6[%134, %c0_37, %c0_38] : memref<2x32x32xbf16, #tpu.memory_space<vmem>>, vector<1x32x32xbf16>
      %136 = vector.shape_cast %135 : vector<1x32x32xbf16> to vector<32x32xbf16>
      %137 = arith.truncf %133 : vector<8x32xf32> to vector<8x32xbf16>
      %cst_39 = arith.constant dense<0.000000e+00> : vector<8x32xf32>
      %138 = tpu.matmul %137, %136, %cst_39 {dimension_numbers = #tpu.dot_dimension_numbers<[1], [0], [0], [1], [0, 0, 1, 1], [], []>} : vector<8x32xbf16>, vector<32x32xbf16>, vector<8x32xf32> -> vector<8x32xf32>
      %139 = arith.addf %arg19, %138 : vector<8x32xf32>
      %140 = arith.index_cast %arg18 : i32 to index
      %c0_40 = arith.constant 0 : index
      %c0_41 = arith.constant 0 : index
      %141 = vector.load %arg7[%140, %c0_40, %c0_41] : memref<2x1x32xf32, #tpu.memory_space<vmem>>, vector<1x1x32xf32>
      %142 = vector.shape_cast %141 : vector<1x1x32xf32> to vector<1x32xf32>
      %143 = vector.broadcast %142 : vector<1x32xf32> to vector<8x32xf32>
      %144 = arith.addf %139, %143 : vector<8x32xf32>
      %145 = arith.index_cast %arg18 : i32 to index
      %c0_42 = arith.constant 0 : index
      %c0_43 = arith.constant 0 : index
      %146 = vector.load %arg8[%145, %c0_42, %c0_43] : memref<2x1x32xf32, #tpu.memory_space<vmem>>, vector<1x1x32xf32>
      %147 = vector.shape_cast %146 : vector<1x1x32xf32> to vector<1x32xf32>
      %148 = arith.index_cast %arg18 : i32 to index
      %c0_44 = arith.constant 0 : index
      %c0_45 = arith.constant 0 : index
      %149 = vector.load %arg9[%148, %c0_44, %c0_45] : memref<2x1x32xf32, #tpu.memory_space<vmem>>, vector<1x1x32xf32>
      %150 = vector.shape_cast %149 : vector<1x1x32xf32> to vector<1x32xf32>
      %cst_46 = arith.constant dense<0.000000e+00> : vector<8xf32>
      %151 = vector.multi_reduction <add>, %144, %cst_46 [1] : vector<8x32xf32> to vector<8xf32>
      %152 = vector.shape_cast %151 : vector<8xf32> to vector<8x1xf32>
      %cst_47 = arith.constant 3.200000e+01 : f32
      %153 = vector.broadcast %cst_47 : f32 to vector<8x1xf32>
      %154 = arith.divf %152, %153 : vector<8x1xf32>
      %155 = vector.broadcast %154 : vector<8x1xf32> to vector<8x32xf32>
      %156 = arith.subf %144, %155 : vector<8x32xf32>
      %157 = arith.mulf %156, %156 : vector<8x32xf32>
      %cst_48 = arith.constant dense<0.000000e+00> : vector<8xf32>
      %158 = vector.multi_reduction <add>, %157, %cst_48 [1] : vector<8x32xf32> to vector<8xf32>
      %159 = vector.shape_cast %158 : vector<8xf32> to vector<8x1xf32>
      %cst_49 = arith.constant 3.200000e+01 : f32
      %160 = vector.broadcast %cst_49 : f32 to vector<8x1xf32>
      %161 = arith.divf %159, %160 : vector<8x1xf32>
      %162 = vector.broadcast %154 : vector<8x1xf32> to vector<8x32xf32>
      %163 = arith.subf %144, %162 : vector<8x32xf32>
      %cst_50 = arith.constant 9.99999974E-6 : f32
      %164 = vector.broadcast %cst_50 : f32 to vector<8x1xf32>
      %165 = arith.addf %161, %164 : vector<8x1xf32>
      %166 = math.rsqrt %165 : vector<8x1xf32>
      %167 = vector.broadcast %166 : vector<8x1xf32> to vector<8x32xf32>
      %168 = arith.mulf %163, %167 : vector<8x32xf32>
      %169 = vector.broadcast %147 : vector<1x32xf32> to vector<8x32xf32>
      %170 = arith.mulf %168, %169 : vector<8x32xf32>
      %171 = vector.broadcast %150 : vector<1x32xf32> to vector<8x32xf32>
      %172 = arith.addf %170, %171 : vector<8x32xf32>
      %173 = arith.index_cast %arg18 : i32 to index
      %c0_51 = arith.constant 0 : index
      %c0_52 = arith.constant 0 : index
      %174 = vector.load %arg10[%173, %c0_51, %c0_52] : memref<2x32x128xbf16, #tpu.memory_space<vmem>>, vector<1x32x128xbf16>
      %175 = vector.shape_cast %174 : vector<1x32x128xbf16> to vector<32x128xbf16>
      %176 = arith.truncf %172 : vector<8x32xf32> to vector<8x32xbf16>
      %cst_53 = arith.constant dense<0.000000e+00> : vector<8x128xf32>
      %177 = tpu.matmul %176, %175, %cst_53 {dimension_numbers = #tpu.dot_dimension_numbers<[1], [0], [0], [1], [0, 0, 1, 1], [], []>} : vector<8x32xbf16>, vector<32x128xbf16>, vector<8x128xf32> -> vector<8x128xf32>
      %178 = arith.index_cast %arg18 : i32 to index
      %c0_54 = arith.constant 0 : index
      %c0_55 = arith.constant 0 : index
      %179 = vector.load %arg11[%178, %c0_54, %c0_55] : memref<2x1x128xf32, #tpu.memory_space<vmem>>, vector<1x1x128xf32>
      %180 = vector.shape_cast %179 : vector<1x1x128xf32> to vector<1x128xf32>
      %181 = vector.broadcast %180 : vector<1x128xf32> to vector<8x128xf32>
      %182 = arith.addf %177, %181 : vector<8x128xf32>
      %cst_56 = arith.constant 5.000000e-01 : f32
      %183 = vector.broadcast %cst_56 : f32 to vector<8x128xf32>
      %184 = arith.mulf %183, %182 : vector<8x128xf32>
      %cst_57 = arith.constant 4.471500e-02 : f32
      %185 = vector.broadcast %cst_57 : f32 to vector<8x128xf32>
      %186 = arith.mulf %185, %182 : vector<8x128xf32>
      %187 = arith.mulf %186, %182 : vector<8x128xf32>
      %188 = arith.mulf %187, %182 : vector<8x128xf32>
      %189 = arith.addf %182, %188 : vector<8x128xf32>
      %cst_58 = arith.constant 0.797884583 : f32
      %190 = vector.broadcast %cst_58 : f32 to vector<8x128xf32>
      %191 = arith.mulf %190, %189 : vector<8x128xf32>
      %192 = math.tanh %191 : vector<8x128xf32>
      %cst_59 = arith.constant 1.000000e+00 : f32
      %193 = vector.broadcast %cst_59 : f32 to vector<8x128xf32>
      %194 = arith.addf %193, %192 : vector<8x128xf32>
      %195 = arith.mulf %184, %194 : vector<8x128xf32>
      %196 = arith.index_cast %arg18 : i32 to index
      %c0_60 = arith.constant 0 : index
      %c0_61 = arith.constant 0 : index
      %197 = vector.load %arg12[%196, %c0_60, %c0_61] : memref<2x128x32xbf16, #tpu.memory_space<vmem>>, vector<1x128x32xbf16>
      %198 = vector.shape_cast %197 : vector<1x128x32xbf16> to vector<128x32xbf16>
      %199 = arith.truncf %195 : vector<8x128xf32> to vector<8x128xbf16>
      %cst_62 = arith.constant dense<0.000000e+00> : vector<8x32xf32>
      %200 = tpu.matmul %199, %198, %cst_62 {dimension_numbers = #tpu.dot_dimension_numbers<[1], [0], [0], [1], [0, 0, 1, 1], [], []>} : vector<8x128xbf16>, vector<128x32xbf16>, vector<8x32xf32> -> vector<8x32xf32>
      %201 = arith.addf %144, %200 : vector<8x32xf32>
      %202 = arith.index_cast %arg18 : i32 to index
      %c0_63 = arith.constant 0 : index
      %c0_64 = arith.constant 0 : index
      %203 = vector.load %arg13[%202, %c0_63, %c0_64] : memref<2x1x32xf32, #tpu.memory_space<vmem>>, vector<1x1x32xf32>
      %204 = vector.shape_cast %203 : vector<1x1x32xf32> to vector<1x32xf32>
      %205 = vector.broadcast %204 : vector<1x32xf32> to vector<8x32xf32>
      %206 = arith.addf %201, %205 : vector<8x32xf32>
      scf.yield %206 : vector<8x32xf32>
    }
    %c2_i32_3 = arith.constant 2 : i32
    %c0_4 = arith.constant 0 : index
    %c0_5 = arith.constant 0 : index
    %8 = vector.load %arg14[%c0_4, %c0_5] : memref<1x32xf32, #tpu.memory_space<vmem>>, vector<1x32xf32>
    %c0_6 = arith.constant 0 : index
    %c0_7 = arith.constant 0 : index
    %9 = vector.load %arg15[%c0_6, %c0_7] : memref<1x32xf32, #tpu.memory_space<vmem>>, vector<1x32xf32>
    %cst_8 = arith.constant dense<0.000000e+00> : vector<8xf32>
    %10 = vector.multi_reduction <add>, %7, %cst_8 [1] : vector<8x32xf32> to vector<8xf32>
    %11 = vector.shape_cast %10 : vector<8xf32> to vector<8x1xf32>
    %cst_9 = arith.constant 3.200000e+01 : f32
    %12 = vector.broadcast %cst_9 : f32 to vector<8x1xf32>
    %13 = arith.divf %11, %12 : vector<8x1xf32>
    %14 = vector.broadcast %13 : vector<8x1xf32> to vector<8x32xf32>
    %15 = arith.subf %7, %14 : vector<8x32xf32>
    %16 = arith.mulf %15, %15 : vector<8x32xf32>
    %cst_10 = arith.constant dense<0.000000e+00> : vector<8xf32>
    %17 = vector.multi_reduction <add>, %16, %cst_10 [1] : vector<8x32xf32> to vector<8xf32>
    %18 = vector.shape_cast %17 : vector<8xf32> to vector<8x1xf32>
    %cst_11 = arith.constant 3.200000e+01 : f32
    %19 = vector.broadcast %cst_11 : f32 to vector<8x1xf32>
    %20 = arith.divf %18, %19 : vector<8x1xf32>
    %21 = vector.broadcast %13 : vector<8x1xf32> to vector<8x32xf32>
    %22 = arith.subf %7, %21 : vector<8x32xf32>
    %cst_12 = arith.constant 9.99999974E-6 : f32
    %23 = vector.broadcast %cst_12 : f32 to vector<8x1xf32>
    %24 = arith.addf %20, %23 : vector<8x1xf32>
    %25 = math.rsqrt %24 : vector<8x1xf32>
    %26 = vector.broadcast %25 : vector<8x1xf32> to vector<8x32xf32>
    %27 = arith.mulf %22, %26 : vector<8x32xf32>
    %28 = vector.broadcast %8 : vector<1x32xf32> to vector<8x32xf32>
    %29 = arith.mulf %27, %28 : vector<8x32xf32>
    %30 = vector.broadcast %9 : vector<1x32xf32> to vector<8x32xf32>
    %31 = arith.addf %29, %30 : vector<8x32xf32>
    %c0_13 = arith.constant 0 : index
    %c0_14 = arith.constant 0 : index
    %32 = vector.load %arg16[%c0_13, %c0_14] : memref<32x128xbf16, #tpu.memory_space<vmem>>, vector<32x128xbf16>
    %33 = arith.truncf %31 : vector<8x32xf32> to vector<8x32xbf16>
    %cst_15 = arith.constant dense<0.000000e+00> : vector<8x128xf32>
    %34 = tpu.matmul %33, %32, %cst_15 {dimension_numbers = #tpu.dot_dimension_numbers<[1], [0], [0], [1], [0, 0, 1, 1], [], []>} : vector<8x32xbf16>, vector<32x128xbf16>, vector<8x128xf32> -> vector<8x128xf32>
    %c0_16 = arith.constant 0 : index
    %c0_17 = arith.constant 0 : index
    %c0_18 = arith.constant 0 : index
    %35 = vector.load %arg17[%c0_16, %c0_17, %c0_18] : memref<1x8x128xf32, #tpu.memory_space<vmem>>, vector<1x8x128xf32>
    %36 = vector.shape_cast %35 : vector<1x8x128xf32> to vector<8x128xf32>
    %37 = vector.shape_cast %34 : vector<8x128xf32> to vector<1x8x128xf32>
    tpu.vector_store %arg17[%c0_16, %c0_17, %c0_18], %37 {strides = array<i32>} : memref<1x8x128xf32, #tpu.memory_space<vmem>>, vector<1x8x128xf32>,
    return
  }
  func.func @transform_0(%arg0: i32) -> (i32, i32, i32) {
    %c0_i32 = arith.constant 0 : i32
    %c0_i32_0 = arith.constant 0 : i32
    %c0_i32_1 = arith.constant 0 : i32
    return %arg0, %c0_i32, %c0_i32_0 : i32, i32, i32
  }
  func.func @transform_1(%arg0: i32) -> (i32, i32, i32) {
    %c0_i32 = arith.constant 0 : i32
    %c0_i32_0 = arith.constant 0 : i32
    %c0_i32_1 = arith.constant 0 : i32
    %c0_i32_2 = arith.constant 0 : i32
    return %c0_i32, %c0_i32_0, %c0_i32_1 : i32, i32, i32
  }
  func.func @transform_2(%arg0: i32) -> (i32, i32, i32) {
    %c0_i32 = arith.constant 0 : i32
    %c0_i32_0 = arith.constant 0 : i32
    %c0_i32_1 = arith.constant 0 : i32
    %c0_i32_2 = arith.constant 0 : i32
    return %c0_i32, %c0_i32_0, %c0_i32_1 : i32, i32, i32
  }
  func.func @transform_3(%arg0: i32) -> (i32, i32, i32) {
    %c0_i32 = arith.constant 0 : i32
    %c0_i32_0 = arith.constant 0 : i32
    %c0_i32_1 = arith.constant 0 : i32
    %c0_i32_2 = arith.constant 0 : i32
    return %c0_i32, %c0_i32_0, %c0_i32_1 : i32, i32, i32
  }
  func.func @transform_4(%arg0: i32) -> (i32, i32, i32) {
    %c0_i32 = arith.constant 0 : i32
    %c0_i32_0 = arith.constant 0 : i32
    %c0_i32_1 = arith.constant 0 : i32
    %c0_i32_2 = arith.constant 0 : i32
    return %c0_i32, %c0_i32_0, %c0_i32_1 : i32, i32, i32
  }
  func.func @transform_5(%arg0: i32) -> (i32, i32, i32) {
    %c0_i32 = arith.constant 0 : i32
    %c0_i32_0 = arith.constant 0 : i32
    %c0_i32_1 = arith.constant 0 : i32
    %c0_i32_2 = arith.constant 0 : i32
    return %c0_i32, %c0_i32_0, %c0_i32_1 : i32, i32, i32
  }
  func.func @transform_6(%arg0: i32) -> (i32, i32, i32) {
    %c0_i32 = arith.constant 0 : i32
    %c0_i32_0 = arith.constant 0 : i32
    %c0_i32_1 = arith.constant 0 : i32
    %c0_i32_2 = arith.constant 0 : i32
    return %c0_i32, %c0_i32_0, %c0_i32_1 : i32, i32, i32
  }
  func.func @transform_7(%arg0: i32) -> (i32, i32, i32) {
    %c0_i32 = arith.constant 0 : i32
    %c0_i32_0 = arith.constant 0 : i32
    %c0_i32_1 = arith.constant 0 : i32
    %c0_i32_2 = arith.constant 0 : i32
    return %c0_i32, %c0_i32_0, %c0_i32_1 : i32, i32, i32
  }
  func.func @transform_8(%arg0: i32) -> (i32, i32, i32) {
    %c0_i32 = arith.constant 0 : i32
    %c0_i32_0 = arith.constant 0 : i32
    %c0_i32_1 = arith.constant 0 : i32
    %c0_i32_2 = arith.constant 0 : i32
    return %c0_i32, %c0_i32_0, %c0_i32_1 : i32, i32, i32
  }
  func.func @transform_9(%arg0: i32) -> (i32, i32, i32) {
    %c0_i32 = arith.constant 0 : i32
    %c0_i32_0 = arith.constant 0 : i32
    %c0_i32_1 = arith.constant 0 : i32
    %c0_i32_2 = arith.constant 0 : i32
    return %c0_i32, %c0_i32_0, %c0_i32_1 : i32, i32, i32
  }
  func.func @transform_10(%arg0: i32) -> (i32, i32, i32) {
    %c0_i32 = arith.constant 0 : i32
    %c0_i32_0 = arith.constant 0 : i32
    %c0_i32_1 = arith.constant 0 : i32
    %c0_i32_2 = arith.constant 0 : i32
    return %c0_i32, %c0_i32_0, %c0_i32_1 : i32, i32, i32
  }
  func.func @transform_11(%arg0: i32) -> (i32, i32, i32) {
    %c0_i32 = arith.constant 0 : i32
    %c0_i32_0 = arith.constant 0 : i32
    %c0_i32_1 = arith.constant 0 : i32
    %c0_i32_2 = arith.constant 0 : i32
    return %c0_i32, %c0_i32_0, %c0_i32_1 : i32, i32, i32
  }
  func.func @transform_12(%arg0: i32) -> (i32, i32, i32) {
    %c0_i32 = arith.constant 0 : i32
    %c0_i32_0 = arith.constant 0 : i32
    %c0_i32_1 = arith.constant 0 : i32
    %c0_i32_2 = arith.constant 0 : i32
    return %c0_i32, %c0_i32_0, %c0_i32_1 : i32, i32, i32
  }
  func.func @transform_13(%arg0: i32) -> (i32, i32) {
    %c0_i32 = arith.constant 0 : i32
    %c0_i32_0 = arith.constant 0 : i32
    %c0_i32_1 = arith.constant 0 : i32
    return %c0_i32, %c0_i32_0 : i32, i32
  }
  func.func @transform_14(%arg0: i32) -> (i32, i32) {
    %c0_i32 = arith.constant 0 : i32
    %c0_i32_0 = arith.constant 0 : i32
    %c0_i32_1 = arith.constant 0 : i32
    return %c0_i32, %c0_i32_0 : i32, i32
  }
  func.func @transform_15(%arg0: i32) -> (i32, i32) {
    %c0_i32 = arith.constant 0 : i32
    %c0_i32_0 = arith.constant 0 : i32
    %c0_i32_1 = arith.constant 0 : i32
    return %c0_i32, %c0_i32_0 : i32, i32
  }
  func.func @transform_16(%arg0: i32) -> (i32, i32, i32) {
    %c0_i32 = arith.constant 0 : i32
    %c0_i32_0 = arith.constant 0 : i32
    %c0_i32_1 = arith.constant 0 : i32
    return %arg0, %c0_i32, %c0_i32_0 : i32, i32, i32
  }
}

</mosaic_0001>

<bundles_post_ra>
// kernel: tpu_custom_call.1
= control target key start
LH: loop header
LB: loop body
LE: loop exit
PB: predicated region body
PF: predicated region fallthrough
CT: control target
= control target key end

     0   :  { %s2416_s0 = inlined_call_operand.vmem [shape: f32[2,8,32], index: 0, kind: input, shape index: {}]   ;;  %s2417_s1 = inlined_call_operand.vmem [shape: f32[2,1,32], index: 1, kind: input, shape index: {}]   ;;  %s2418_s2 = inlined_call_operand.vmem [shape: f32[2,1,32], index: 2, kind: input, shape index: {}]   ;;  %s2419_s3 = inlined_call_operand.vmem [shape: bf16[2,32,96], index: 3, kind: input, shape index: {}]   ;;  %s2420_s4 = inlined_call_operand.vmem [shape: f32[2,1,96], index: 4, kind: input, shape index: {}]   ;;  %s2421_s5 = inlined_call_operand.vmem [shape: bf16[2,32,32], index: 5, kind: input, shape index: {}]   ;;  %s2422_s6 = inlined_call_operand.vmem [shape: f32[2,1,32], index: 6, kind: input, shape index: {}]   ;;  %s2423_s7 = inlined_call_operand.vmem [shape: f32[2,1,32], index: 7, kind: input, shape index: {}]   ;;  %s2424_s8 = inlined_call_operand.vmem [shape: f32[2,1,32], index: 8, kind: input, shape index: {}]   ;;  %s2425_s9 = inlined_call_operand.vmem [shape: bf16[2,32,128], index: 9, kind: input, shape index: {}]   ;;  %s2426_s10 = inlined_call_operand.vmem [shape: f32[2,1,128], index: 10, kind: input, shape index: {}]   ;;  %s2427_s11 = inlined_call_operand.vmem [shape: bf16[2,128,32], index: 11, kind: input, shape index: {}]   ;;  %s2428_s12 = inlined_call_operand.vmem [shape: f32[2,1,32], index: 12, kind: input, shape index: {}]   ;;  %s2429_s13 = inlined_call_operand.vmem [shape: f32[1,32], index: 13, kind: input, shape index: {}]   ;;  %s2430_s14 = inlined_call_operand.vmem [shape: f32[1,32], index: 14, kind: input, shape index: {}]   ;;  %s2431_s15 = inlined_call_operand.vmem [shape: bf16[32,128], index: 15, kind: input, shape index: {}]   ;;  %s2432_s16 = inlined_call_operand.hbm [shape: f32[2,8,128], index: 16, kind: output, shape index: {}]  }
   0x1   :  { %2441 = sst [smem:[#allocation11_spill]] %s2416_s0 }
   0x2   :  { %2442 = sst [smem:[#allocation12_spill]] %s2419_s3 }
   0x3   :  { %2443 = sst [smem:[#allocation13_spill]] %s2432_s16 }
   0x4   :  { %21 = vsyncpa [#allocation3], 0 }
   0x5   :  { %23 = vsyncpa [#allocation3 + $0x1], 0  ;;  %s2083_s21 = smov 0   ;;  %s2085_s22 = smov 0  }
   0x6   :  { %s2087_s23 = smov 0   ;;  %s2089_s24 = smov 0  }
   0x7 LB: > { %2444 = sst [smem:[#allocation5_spill]] %s1963_s21  ;;  %s2104_s25 = sadd.s32 4294967295, %s1975_s24   ;;  %s1975_s24 = sphi %s2089_s24, %s2462_s24   ;;  %s1971_s23 = sphi %s2087_s23, %s2464_s23   ;;  %s1967_s22 = sphi %s2085_s22, %s2466_s22   ;;  %s1963_s21 = sphi %s2083_s21, %s2465_s21  }
   0x8   : > { %2445 = sst [smem:[#allocation6_spill]] %s1971_s23  ;;  %s1603_s26 = sadd.s32 4294967294, %s1975_s24  }
   0x9   : > { %2446 = sst [smem:[#allocation7_spill]] %s1975_s24  ;;  %s2108_s27 = sadd.s32 1, %s1975_s24  }
   0xa   : > { %2447 = sst [smem:[#allocation8_spill]] %s2108_s27  ;;  %s377_s28 = sadd.s32 1, %s1971_s23 }
   0xb   : > { %s374_s29 = ssub.s32 %s1975_s24, %s2108_s27  ;;  %p387_p0 = scmp.ne.s32.totalorder %s1971_s23, %s1967_s22 }
   0xc   : > { %p375_p1 = scmp.eq.s32.totalorder %s374_s29, 0  ;;  %p388_p2 = scmp.eq.s32.totalorder %s2104_s25, 1 }
   0xd   : > { %p393_p3 = scmp.ne.s32.totalorder %s1967_s22, %s1963_s21  ;;  %p394_p4 = scmp.eq.s32.totalorder %s1603_s26, 1 }
   0xe   : > { %s2119_s30 = scalar_select %p375_p1, %s1971_s23, %s377_s28  }
   0xf   : > { %p2121_p5 = por %p388_p2, %p387_p0  ;;  %p2125_p6 = por %p394_p4, %p393_p3 }
  0x10   : > { %2448 = sst [smem:[#allocation9_spill]] %s2119_s30  ;;  %p1606_p7 = scmp.ge.s32.totalorder %s1975_s24, 1 }
  0x11   : > { %s2450_s17 = scalar_select %p2125_p6, 1, 0 }
  0x12   : > { %p464_p8 = scmp.lt.s32.totalorder %s1975_s24, 3 }
  0x13   : > { %2451 = sst [smem:[#allocation10_spill]] %s2450_s17 }
  0x14   : > { %p465_p9 = pnand %p1606_p7, %p464_p8 }
  0x15   : > { %s2436_s18 = sand.u32 (!%p465_p9), 1, %s1967_s22   ;;  %p513_p10 = scmp.lt.s32.totalorder (!%p465_p9), %s2104_s25, 1  ;;  %v518_v0 = vlaneseq (!%p465_p9) }
  0x16   : > { %468 = sbr.rel (%p465_p9) target bundleno = 3204 (0xc84), region = 84  ;;  %s2135_s19 = sshll.u32 (!%p465_p9), %s2436_s18, 3 }
  0x17   : > { %v2137_v1 = vshrl.u32 (!%p465_p9), %v518_v0, 7  ;;  %v2139_v2 = vand.u32 (!%p465_p9), 127, %v518_v0  ;;  %s2452_s30 = sld [smem:[#allocation11_spill]] (!%p465_p9)  ;;  %s2150_s18 = smov (!%p465_p9), 0  }
  0x19   : > { %vm522_vm0 = vcmp.ge.s32.totalorder (!%p465_p9), %v2137_v1, %v2139_v2 }
  0x1d   : > { %s514_s20 = scalar_select %p513_p10, %s2104_s25, 1 }
  0x1f   : > { %s1608_s26 = sshll.u32 %s514_s20, 3 }
  0x20   : > { %s516_s23 = scalar_lea.vmem %s2452_s30, %s1608_s26 }
  0x21   : > { %v523_v3 = vld [vmem:[%s516_s23] sm:$0xff]  }
  0x22 LB: >> { %vm535_vm1 = vcmask 261120   ;;  %v1985_v10 = vmov 0.0   ;;  %vm1986_vm2 = vmmov 0   ;;  %s1657_s23 = sshll.u32 %s1983_s18, 4  ;;  %s2453_s3 = sld [smem:[#allocation12_spill]]  ;;  %vm652_vm3 = vcmask 64512   ;;  %s1983_s18 = sphi %s2150_s18, %s529_s18   ;;  %v1979_v3 = vphi %v523_v3, %v2454_v3  }
  0x23   : >> { %v536_v4 = vsel %vm535_vm1, %v1979_v3, 0.0  ;;  %1698 = vmatprep.subr.bf16.mxu0 %v1985_v10  ;;  %1702 = vmatprep.mubr.msk.bf16.mxu0 %vm1986_vm2, %v1985_v10  ;;  %s2175_s27 = scalar_lea.vmem %s2421_s5, %s1657_s23  ;;  %s1660_s17 = sshll.u32 %s1983_s18, 6  ;;  %vm909_vm4 = vcmask 1043456   ;;  %vm1110_vm5 = vcmask 130048   ;;  %vm1112_vm6 = vcmask 195584  }
  0x24   : >> { %537 = vadd.xlane.f32.xlu0 %v536_v4  ;;  %1718 = vmatprep.subr.bf16.mxu1 %v1985_v10  ;;  %s2181_s16 = scalar_lea.vmem %s2425_s9, %s1657_s23  ;;  %s531_s21 = scalar_lea.vmem %s2417_s1, %s1983_s18 }
  0x25   : >> { %1720 = vmatprep.mubr.msk.bf16.mxu1 %vm1986_vm2, %v1985_v10  ;;  %s533_s29 = scalar_lea.vmem %s2418_s2, %s1983_s18  ;;  %v1609_v17 = vld [vmem:[%s531_s21] ss:$0 sm:$0xff]  ;;  %s572_s20 = scalar_lea.vmem %s2420_s4, %s1983_s18 }
  0x26   : >> { %v1610_v19 = vld [vmem:[%s533_s29] ss:$0 sm:$0xff]  ;;  %s1988_s28 = smov 120   ;;  %s1989_s21 = smov 112  }
  0x27   : >> { %v1613_v23 = vld [vmem:[%s572_s20] ss:$0 sm:$0xff]  ;;  %s1990_s24 = smov 96   ;;  %s1992_s29 = smov 8  }
  0x28   : >> { %s566_s26 = scalar_lea.vmem %s2453_s3, %s1657_s23  ;;  %s2187_s3 = scalar_lea.vmem %s2427_s11, %s1660_s17 }
  0x29   : >> { %v1865_v11 = vld [vmem:[%s566_s26] sm:$0xff]   ;;  %v1866_v12 = vld [vmem:[%s566_s26 + $0x8] sm:$0xff]   ;;  %s1987_s26 = smov 104   ;;  %s1991_s23 = smov 64  }
  0x2a   : >> { %1699 = vmatpush3.bf16.msra.mxu0 %v1865_v11  ;;  %s1993_s17 = smov 16   ;;  %s1994_s30 = smov 24  }
  0x2b   : >> { %1700 = vmatprep.subr.bf16.mxu0 %v1985_v10 }
  0x2e   : >> { %1701 = vmatpush3.bf16.msra.mxu0 %v1866_v12 }
  0x2f   : >> { %1706 = vmatprep.subr.bf16.mxu0 %v1985_v10 }
  0xb1   : >> { %v538_v5 = vpop.xlane.xlu0 %537 }
  0xb2   : >> { %v540_v6 = vmul.f32 0.03125, %v538_v5 }
  0xb4   : >> { %v541_v7 = vsub.f32 %v1979_v3, %v540_v6 }
  0xb6   : >> { %v542_v8 = vmul.f32 %v541_v7, %v541_v7 }
  0xb8   : >> { %v543_v9 = vsel %vm535_vm1, %v542_v8, 0.0 }
  0xb9   : >> { %544 = vadd.xlane.f32.xlu0 %v543_v9 }
 0x146   : >> { %v545_v13 = vpop.xlane.xlu0 %544 }
 0x147   : >> { %v546_v14 = vmul.f32 0.03125, %v545_v13 }
 0x149   : >> { %v547_v15 = vadd.f32 1e-05, %v546_v14 }
 0x14b   : >> { %1879 = vrsqrt.f32 %v547_v15 }
 0x155   : >> { %v1880_v16 = vpop.eup %1879 }
 0x156   : >> { %v549_v18 = vmul.f32 %v1880_v16, %v541_v7 }
 0x158   : >> { %v556_v20 = vmul.f32 %v1609_v17, %v549_v18 }
 0x15a   : >> { %v563_v21 = vadd.f32 %v1610_v19, %v556_v20 }
 0x15c   : >> { %v571_v22 = vpack.c.bf16 %v563_v21, %v563_v21 }
 0x15e   : >> { %1703 = vmatmul.mubr.msk.bf16.vlgmr.msra.gmra.mrb[0].mxu0 %vm535_vm1, %v571_v22 }
 0x15f   : >> { %1708 = vmatprep.mubr.msk.bf16.mxu0 %vm1986_vm2, %v1985_v10 }
 0x231   : >> { %v629_v24 = vpop.f32.mrb[0].mxu0 }
 0x232   : >> { %v630_v25 = vadd.f32 %v1613_v23, %v629_v24  ;;  %v1704_v26 = vpop.f32.mrb[1].mxu0 }
 0x233   : >> { %v632_v27 = vpop.f32.mrb[2].mxu0 }
 0x234   : >> { %642 = vrot.lane.b32.xlu0 %v630_v25, %s1987_s26  ;;  %636 = vrot.lane.b32.xlu1 %v630_v25, %s1988_s28  ;;  %v1705_v28 = vpop.f32.mrb[3].mxu0  ;;  %v2205_v29 = vpack.c.bf16 %v630_v25, %v630_v25  ;;  %s1177_s26 = scalar_lea.vmem %s2422_s6, %s1983_s18 }
 0x238   : >> { %639 = vrot.lane.b32.xlu1 %v630_v25, %s1989_s21 }
 0x23c   : >> { %650 = vrot.lane.b32.xlu1 %v2205_v29, %s1990_s24 }
 0x2a6   : >> { %v637_v30 = vpop.permute.xlu1 %636  ;;  %v643_v34 = vpop.permute.xlu0 %642 }
 0x2a7   : >> { %v2208_v31 = vpack.c.bf16 %v637_v30, %v637_v30  ;;  %v2214_v36 = vpack.c.bf16 %v643_v34, %v643_v34 }
 0x2a9   : >> { %700 = vrot.lane.b32.xlu1 %v2208_v31, %s1990_s24 }
 0x2aa   : >> { %v640_v32 = vpop.permute.xlu1 %639 }
 0x2ab   : >> { %v2211_v33 = vpack.c.bf16 %v640_v32, %v640_v32 }
 0x2ad   : >> { %749 = vrot.lane.b32.xlu1 %v2211_v33, %s1990_s24 }
 0x2ae   : >> { %v651_v35 = vpop.permute.xlu1 %650 }
 0x2af   : >> { %v657_v37 = vsel %vm652_vm3, %v651_v35, 0 }
 0x2b0   : >> { %1707 = vmatpush3.bf16.xpose.msra.mxu0 %v657_v37 }
 0x2b1   : >> { %798 = vrot.lane.b32.xlu1 %v2214_v36, %s1990_s24  ;;  %1712 = vmatprep.subr.bf16.mxu0 %v1985_v10  ;;  %s1186_s24 = scalar_lea.vmem %s2423_s7, %s1983_s18 }
 0x2b7   : >> { %1709 = vmatmul.mubr.msk.bf16.vlgmr.msra.gmra.mrb[4].mxu0 %vm652_vm3, %v2205_v29 }
 0x2b8   : >> { %1714 = vmatprep.mubr.msk.bf16.mxu0 %vm1986_vm2, %v1985_v10 }
 0x31b   : >> { %v701_v38 = vpop.permute.xlu1 %700 }
 0x31c   : >> { %v706_v39 = vsel %vm652_vm3, %v701_v38, 0 }
 0x31d   : >> { %1713 = vmatpush3.bf16.xpose.msra.mxu0 %v706_v39 }
 0x31e   : >> { %1724 = vmatprep.subr.bf16.mxu0 %v1985_v10 }
 0x31f   : >> { %v750_v40 = vpop.permute.xlu1 %749 }
 0x320   : >> { %v755_v41 = vsel %vm652_vm3, %v750_v40, 0 }
 0x321   : >> { %1719 = vmatpush3.bf16.xpose.msra.mxu1 %v755_v41 }
 0x322   : >> { %1730 = vmatprep.subr.bf16.mxu1 %v1985_v10 }
 0x323   : >> { %v799_v42 = vpop.permute.xlu1 %798 }
 0x324   : >> { %v804_v43 = vsel %vm652_vm3, %v799_v42, 0  ;;  %1715 = vmatmul.mubr.msk.bf16.vlgmr.msra.gmra.mrb[8].mxu0 %vm652_vm3, %v2208_v31 }
 0x325   : >> { %1725 = vmatpush3.bf16.xpose.msra.mxu0 %v804_v43  ;;  %1726 = vmatprep.mubr.msk.bf16.mxu0 %vm1986_vm2, %v1985_v10 }
 0x326   : >> { %1736 = vmatprep.subr.bf16.mxu0 %v1985_v10 }
 0x328   : >> { %1721 = vmatmul.mubr.msk.bf16.vlgmr.msra.gmra.mrb[0].mxu1 %vm652_vm3, %v2211_v33 }
 0x329   : >> { %1732 = vmatprep.mubr.msk.bf16.mxu1 %vm1986_vm2, %v1985_v10 }
 0x32c   : >> { %1727 = vmatmul.mubr.msk.bf16.vlgmr.msra.gmra.mrb[12].mxu0 %vm652_vm3, %v2214_v36 }
 0x32d   : >> { %1738 = vmatprep.mubr.msk.bf16.mxu0 %vm1986_vm2, %v1985_v10 }
 0x38a   : >> { %v693_v44 = vpop.f32.mrb[4].mxu0 }
 0x38b   : >> { %v846_v45 = vmul.f32 0.35355338, %v693_v44  ;;  %v1710_v46 = vpop.f32.mrb[5].mxu0 }
 0x38c   : >> { %v696_v47 = vpop.f32.mrb[6].mxu0 }
 0x38d   : >> { %v852_v48 = vsel %vm522_vm0, %v846_v45, -1e+30  ;;  %v1711_v49 = vpop.f32.mrb[7].mxu0 }
 0x38e   : >> { %v856_v50 = vsel %vm652_vm3, %v852_v48, -inf }
 0x38f   : >> { %857 = vmax.xlane.f32.xlu1 %v856_v50 }
 0x3f7   : >> { %v742_v51 = vpop.f32.mrb[8].mxu0 }
 0x3f8   : >> { %v847_v52 = vmul.f32 0.35355338, %v742_v51  ;;  %v1716_v53 = vpop.f32.mrb[9].mxu0 }
 0x3f9   : >> { %v745_v54 = vpop.f32.mrb[10].mxu0 }
 0x3fa   : >> { %v853_v55 = vsel %vm522_vm0, %v847_v52, -1e+30  ;;  %v1717_v56 = vpop.f32.mrb[11].mxu0 }
 0x3fb   : >> { %v791_v57 = vpop.f32.mrb[0].mxu1  ;;  %v859_v58 = vsel %vm652_vm3, %v853_v55, -inf }
 0x3fc   : >> { %v848_v59 = vmul.f32 0.35355338, %v791_v57  ;;  %v1722_v60 = vpop.f32.mrb[1].mxu1  ;;  %860 = vmax.xlane.f32.xlu0 %v859_v58 }
 0x3fd   : >> { %v794_v61 = vpop.f32.mrb[2].mxu1  ;;  %v1867_v60 = vld [vmem:[%s2175_s27] sm:$0xff]  }
 0x3fe   : >> { %v854_v62 = vsel %vm522_vm0, %v848_v59, -1e+30  ;;  %v1723_v63 = vpop.f32.mrb[3].mxu1  ;;  %v1868_v61 = vld [vmem:[%s2175_s27 + $0x8] sm:$0xff]   ;;  %s1224_s27 = scalar_lea.vmem %s2426_s10, %s1983_s18 }
 0x3ff   : >> { %v840_v0 = vpop.f32.mrb[12].mxu0  ;;  %v862_v4 = vsel %vm652_vm3, %v854_v62, -inf }
 0x400   : >> { %v849_v5 = vmul.f32 0.35355338, %v840_v0  ;;  %863 = vmax.xlane.f32.xlu1 %v862_v4  ;;  %v1728_v6 = vpop.f32.mrb[13].mxu0 }
 0x401   : >> { %v843_v7 = vpop.f32.mrb[14].mxu0 }
 0x402   : >> { %v855_v8 = vsel %vm522_vm0, %v849_v5, -1e+30  ;;  %v1729_v9 = vpop.f32.mrb[15].mxu0 }
 0x403   : >> { %v865_v11 = vsel %vm652_vm3, %v855_v8, -inf }
 0x404   : >> { %866 = vmax.xlane.f32.xlu0 %v865_v11 }
 0x411   : >> { %904 = vrot.lane.b32.xlu1 %v2205_v29, %s1991_s23 }
 0x41c   : >> { %v858_v12 = vpop.xlane.xlu1 %857 }
 0x41d   : >> { %v868_v13 = vsub.f32 %v852_v48, %v858_v12 }
 0x41f   : >> { %v872_v14 = vmul.f32 1.442695, %v868_v13 }
 0x421   : >> { %1881 = vpow2.f32 %v872_v14 }
 0x42b   : >> { %v1882_v15 = vpop.eup %1881 }
 0x42c   : >> { %v880_v16 = vsel %vm652_vm3, %v1882_v15, 0.0 }
 0x435   : >> { %881 = vadd.xlane.f32.xlu1 %v880_v16 }
 0x489   : >> { %v861_v17 = vpop.xlane.xlu0 %860 }
 0x48a   : >> { %v869_v18 = vsub.f32 %v853_v55, %v861_v17 }
 0x48c   : >> { %v874_v19 = vmul.f32 1.442695, %v869_v18 }
 0x48d   : >> { %v864_v20 = vpop.xlane.xlu1 %863 }
 0x48e   : >> { %1883 = vpow2.f32 %v874_v19  ;;  %v870_v21 = vsub.f32 %v854_v62, %v864_v20 }
 0x490   : >> { %v876_v22 = vmul.f32 1.442695, %v870_v21 }
 0x491   : >> { %v905_v23 = vpop.permute.xlu1 %904  ;;  %v867_v24 = vpop.xlane.xlu0 %866 }
 0x492   : >> { %1885 = vpow2.f32 %v876_v22  ;;  %v911_v25 = vsel %vm909_vm4, %v905_v23, 0  ;;  %v871_v26 = vsub.f32 %v855_v8, %v867_v24  ;;  %v1629_v22 = vld [vmem:[%s1177_s26] ss:$0 sm:$0xff]  ;;  %s1405_s26 = scalar_lea.vmem %s2428_s12, %s1983_s18 }
 0x493   : >> { %1731 = vmatpush3.bf16.msra.mxu1 %v911_v25 }
 0x494   : >> { %v878_v27 = vmul.f32 1.442695, %v871_v26  ;;  %1742 = vmatprep.subr.bf16.mxu1 %v1985_v10 }
 0x496   : >> { %1887 = vpow2.f32 %v878_v27 }
 0x498   : >> { %v1884_v28 = vpop.eup %1883 }
 0x499   : >> { %v883_v29 = vsel %vm652_vm3, %v1884_v28, 0.0 }
 0x49a   : >> { %884 = vadd.xlane.f32.xlu0 %v883_v29 }
 0x49c   : >> { %v1886_v30 = vpop.eup %1885 }
 0x49d   : >> { %v886_v32 = vsel %vm652_vm3, %v1886_v30, 0.0 }
 0x49e   : >> { %887 = vadd.xlane.f32.xlu1 %v886_v32 }
 0x4a0   : >> { %v1888_v34 = vpop.eup %1887 }
 0x4a1   : >> { %v889_v35 = vsel %vm652_vm3, %v1888_v34, 0.0 }
 0x4a2   : >> { %890 = vadd.xlane.f32.xlu0 %v889_v35  ;;  %v1869_v35 = vld [vmem:[%s2181_s16] sm:$0xff]  }
 0x4af   : >> { %1001 = vrot.lane.b32.xlu1 %v2211_v33, %s1991_s23 }
 0x4b3   : >> { %1049 = vrot.lane.b32.xlu1 %v2214_v36, %s1991_s23 }
 0x4b8   : >> { %953 = vrot.lane.b32.xlu0 %v2208_v31, %s1991_s23 }
 0x4c2   : >> { %v882_v37 = vpop.xlane.xlu1 %881 }
 0x4c3   : >> { %1889 = vrcp.f32 %v882_v37  ;;  %v1870_v37 = vld [vmem:[%s2181_s16 + $0x8] sm:$0xff]   ;;  %s1188_s16 = scalar_lea.vmem %s2424_s8, %s1983_s18  ;;  %s529_s18 = sadd.s32 1, %s1983_s18  }
 0x4c4   : >> { %p526_p11 = scmp.ge.s32.totalorder %s529_s18, 2  }
 0x4c5   : > { %vm1996_vm7 = vmmov (%p526_p11), 0   ;;  %v1902_v1 = vld [vmem:[%s2431_s15 + $0x8] sm:$0xff] (%p526_p11)   ;;  %s2456_s28 = sld [smem:[#allocation13_spill]] (%p526_p11) }
 0x4cd   : >> { %v1890_v38 = vpop.eup %1889 }
 0x4ce   : >> { %v896_v39 = vmul.f32 %v1890_v38, %v1882_v15  ;;  %v1871_v38 = vld [vmem:[%s2187_s3] sm:$0xff]  }
 0x4d0   : >> { %v900_v40 = vpack.c.bf16 %v896_v39, %v896_v39 }
 0x4d2   : >> { %1733 = vmatmul.mubr.msk.bf16.vlgmr.msra.gmra.mrb[4].mxu1 %vm652_vm3, %v900_v40 }
 0x4d3   : >> { %1744 = vmatprep.mubr.msk.bf16.mxu1 %vm1986_vm2, %v1985_v10 }
 0x527   : >> { %v885_v41 = vpop.xlane.xlu0 %884 }
 0x528   : >> { %1891 = vrcp.f32 %v885_v41 }
 0x52b   : >> { %v888_v42 = vpop.xlane.xlu1 %887 }
 0x52c   : >> { %1893 = vrcp.f32 %v888_v42 }
 0x52f   : >> { %v1002_v33 = vpop.permute.xlu1 %1001  ;;  %v891_v43 = vpop.xlane.xlu0 %890 }
 0x530   : >> { %v1007_v36 = vsel %vm909_vm4, %v1002_v33, 0  ;;  %1895 = vrcp.f32 %v891_v43  ;;  %v1630_v33 = vld [vmem:[%s1186_s24] ss:$0 sm:$0xff]  ;;  %s2458_s24 = sand.u32 (%p526_p11), 1, %s1967_s22  }
 0x531   : >> { %1743 = vmatpush3.bf16.msra.mxu1 %v1007_v36  ;;  %v1631_v36 = vld [vmem:[%s1188_s16] ss:$0 sm:$0xff]  ;;  %s1507_s23 = scalar_lea.sflag (%p526_p11), [#allocation3], %s2458_s24 }
 0x532   : >> { %v1892_v31 = vpop.eup %1891  ;;  %1754 = vmatprep.subr.bf16.mxu1 %v1985_v10 }
 0x533   : >> { %v897_v44 = vmul.f32 %v1892_v31, %v1884_v28  ;;  %v954_v45 = vpop.permute.xlu0 %953  ;;  %v1050_v47 = vpop.permute.xlu1 %1049 }
 0x534   : >> { %v959_v46 = vsel %vm909_vm4, %v954_v45, 0  ;;  %v1055_v51 = vsel %vm909_vm4, %v1050_v47, 0  ;;  %v1873_v47 = vld [vmem:[%s2187_s3 + $0x10] sm:$0xff]  }
 0x535   : >> { %1737 = vmatpush3.bf16.msra.mxu0 %v959_v46  ;;  %v901_v48 = vpack.c.bf16 %v897_v44, %v897_v44  ;;  %v1872_v46 = vld [vmem:[%s2187_s3 + $0x8] sm:$0xff]  }
 0x536   : >> { %v1894_v49 = vpop.eup %1893  ;;  %1748 = vmatprep.subr.bf16.mxu0 %v1985_v10 }
 0x537   : >> { %v898_v50 = vmul.f32 %v1894_v49, %v1886_v30  ;;  %v1875_v49 = vld [vmem:[%s2187_s3 + $0x20] sm:$0xff]  }
 0x538   : >> { %1739 = vmatmul.mubr.msk.bf16.vlgmr.msra.gmra.mrb[16].mxu0 %vm652_vm3, %v901_v48  ;;  %v1874_v48 = vld [vmem:[%s2187_s3 + $0x18] sm:$0xff]  }
 0x539   : >> { %1749 = vmatpush3.bf16.msra.mxu0 %v1055_v51  ;;  %v902_v52 = vpack.c.bf16 %v898_v50, %v898_v50  ;;  %1750 = vmatprep.mubr.msk.bf16.mxu0 %vm1986_vm2, %v1985_v10  ;;  %v1876_v50 = vld [vmem:[%s2187_s3 + $0x28] sm:$0xff]   ;;  %v1877_v51 = vld [vmem:[%s2187_s3 + $0x30] sm:$0xff]  }
 0x53a   : >> { %v1896_v53 = vpop.eup %1895  ;;  %1762 = vmatprep.subr.bf16.mxu0 %v1985_v10 }
 0x53b   : >> { %v899_v54 = vmul.f32 %v1896_v53, %v1888_v34  ;;  %1745 = vmatmul.mubr.msk.bf16.vlgmr.msra.gmra.mrb[8].mxu1 %vm652_vm3, %v902_v52  ;;  %v1878_v52 = vld [vmem:[%s2187_s3 + $0x38] sm:$0xff]   ;;  %v1633_v53 = vld [vmem:[%s1224_s27] ss:$0 sm:$0xff]  ;;  %s2455_s27 = scalar_lea.vmem (%p526_p11), [#allocation2], %s2135_s19 }
 0x53c   : >> { %1758 = vmatprep.mubr.msk.bf16.mxu1 %vm1986_vm2, %v1985_v10  ;;  %1755 = vmatpush3.bf16.msra.mxu1 %v1867_v60  ;;  %s1520_s3 = sshll.u32 (%p526_p11), %s2455_s27, 4  ;;  %s2457_s18 = smov (%p526_p11), %s2455_s27  ;;  %s2372_s3 = int_to_ptr.vmem [resolvable:$true] %s1520_s3 }
 0x53d   : >> { %v903_v55 = vpack.c.bf16 %v899_v54, %v899_v54  ;;  %1756 = vmatprep.subr.bf16.mxu1 %v1985_v10 }
 0x540   : >> { %1751 = vmatmul.mubr.msk.bf16.vlgmr.msra.gmra.mrb[20].mxu0 %vm652_vm3, %v903_v55  ;;  %1757 = vmatpush3.bf16.msra.mxu1 %v1868_v61 }
 0x541   : >> { %1766 = vmatprep.mubr.msk.bf16.mxu0 %vm1986_vm2, %v1985_v10  ;;  %1770 = vmatprep.subr.bf16.mxu1 %v1985_v10 }
 0x542   : >> { %1763 = vmatpush3.bf16.msra.mxu0 %v1869_v35 }
 0x543   : >> { %1764 = vmatprep.subr.bf16.mxu0 %v1985_v10 }
 0x546   : >> { %1765 = vmatpush3.bf16.msra.mxu0 %v1870_v37 }
 0x5a5   : >> { %v947_v56 = vpop.f32.mrb[4].mxu1 }
 0x5a6   : >> { %v1734_v57 = vpop.f32.mrb[5].mxu1 }
 0x5a7   : >> { %v950_v58 = vpop.f32.mrb[6].mxu1 }
 0x5a8   : >> { %v1735_v59 = vpop.f32.mrb[7].mxu1 }
 0x60b   : >> { %v995_v62 = vpop.f32.mrb[16].mxu0 }
 0x60c   : >> { %1098 = vrot.lane.b32.xlu0 %v995_v62, %s1992_s29  ;;  %v1740_v63 = vpop.f32.mrb[17].mxu0  ;;  %s1997_s29 = smov (%p526_p11), [#allocation2]  }
 0x60d   : >> { %v998_v0 = vpop.f32.mrb[18].mxu0  ;;  %s1909_s16 = sshll.u32 (%p526_p11), %s1997_s29, 4  ;;  %s1910_s16 = int_to_ptr.vmem [resolvable:$false] %s1909_s16 }
 0x60e   : >> { %v1741_v4 = vpop.f32.mrb[19].mxu0  ;;  %v1043_v5 = vpop.f32.mrb[8].mxu1  ;;  %p1912_p1 = scmp.lt.s32.totalorder (%p526_p11), %s2372_s3, %s1910_s16 }
 0x60f   : >> { %1102 = vrot.lane.b32.xlu1 %v1043_v5, %s1993_s17  ;;  %v1746_v6 = vpop.f32.mrb[9].mxu1  ;;  %s1911_s17 = scalar_lea.vmem (%p526_p11), %s1910_s16, 256 }
 0x610   : >> { %v1046_v7 = vpop.f32.mrb[10].mxu1 }
 0x611   : >> { %v1747_v8 = vpop.f32.mrb[11].mxu1 }
 0x612   : >> { %v1647_v8 = vld [vmem:[%s1405_s26] ss:$0 sm:$0xff] }
 0x613   : >> { %v1091_v9 = vpop.f32.mrb[20].mxu0 }
 0x614   : >> { %1106 = vrot.lane.b32.xlu0 %v1091_v9, %s1994_s30  ;;  %v1752_v11 = vpop.f32.mrb[21].mxu0  ;;  %s1654_s30 = sshll.u32 (%p526_p11), %s2104_s25, 7  ;;  %s1905_s25 = scalar_lea.vmem (%p526_p11), %s2372_s3, 128 }
 0x615   : >> { %v1094_v12 = vpop.f32.mrb[22].mxu0  ;;  %s2370_s21 = scalar_lea.hbm (%p526_p11), %s2456_s28, %s1654_s30  ;;  %p1906_p12 = scmp.ne.s32.totalorder (%p526_p11), %s2372_s3, %s1905_s25 }
 0x616   : >> { %v1753_v13 = vpop.f32.mrb[23].mxu0  ;;  %p1913_p2 = scmp.lt.s32.totalorder (%p526_p11), %s1911_s17, %s1905_s25 }
 0x617   : > { %p1907_p13 = pnand (%p526_p11), %p1906_p12, %p2121_p5 }
 0x618   : > { %p1914_p3 = por (%p526_p11), %p1913_p2, %p1912_p1 }
 0x619   : > { %p1908_p0 = pneg (%p526_p11), %p1907_p13 }
 0x61b   : > { %p1915_p4 = pnand (%p526_p11), %p1914_p3, %p1908_p0 }
 0x67e   : >> { %v1099_v14 = vpop.permute.xlu0 %1098 }
 0x67f   : >> { %v1109_v16 = vsel %vm652_vm3, %v947_v56, %v1099_v14 }
 0x681   : >> { %v1103_v15 = vpop.permute.xlu1 %1102 }
 0x682   : >> { %v1111_v17 = vsel %vm1110_vm5, %v1109_v16, %v1103_v15 }
 0x686   : >> { %v1107_v18 = vpop.permute.xlu0 %1106 }
 0x687   : >> { %v1113_v19 = vsel %vm1112_vm6, %v1111_v17, %v1107_v18 }
 0x688   : >> { %v1120_v20 = vpack.c.bf16 %v1113_v19, %v1113_v19 }
 0x68a   : >> { %1759 = vmatmul.mubr.msk.bf16.vlgmr.msra.gmra.mrb[12].mxu1 %vm535_vm1, %v1120_v20 }
 0x68b   : >> { %1786 = vmatprep.mubr.msk.bf16.mxu1 %vm1986_vm2, %v1985_v10  ;;  %1771 = vmatpush3.bf16.msra.mxu1 %v1871_v38 }
 0x68c   : >> { %1772 = vmatprep.subr.bf16.mxu1 %v1985_v10 }
 0x68f   : >> { %1773 = vmatpush3.bf16.msra.mxu1 %v1872_v46 }
 0x690   : >> { %1774 = vmatprep.subr.bf16.mxu1 %v1985_v10 }
 0x693   : >> { %1775 = vmatpush3.bf16.msra.mxu1 %v1873_v47 }
 0x694   : >> { %1776 = vmatprep.subr.bf16.mxu1 %v1985_v10 }
 0x697   : >> { %1777 = vmatpush3.bf16.msra.mxu1 %v1874_v48 }
 0x698   : >> { %1778 = vmatprep.subr.bf16.mxu1 %v1985_v10 }
 0x69b   : >> { %1779 = vmatpush3.bf16.msra.mxu1 %v1875_v49 }
 0x69c   : >> { %1780 = vmatprep.subr.bf16.mxu1 %v1985_v10 }
 0x69f   : >> { %1781 = vmatpush3.bf16.msra.mxu1 %v1876_v50 }
 0x6a0   : >> { %1782 = vmatprep.subr.bf16.mxu1 %v1985_v10 }
 0x6a3   : >> { %1783 = vmatpush3.bf16.msra.mxu1 %v1877_v51 }
 0x6a4   : >> { %1784 = vmatprep.subr.bf16.mxu1 %v1985_v10 }
 0x6a7   : >> { %1785 = vmatpush3.bf16.msra.mxu1 %v1878_v52 }
 0x75d   : >> { %v1170_v21 = vpop.f32.mrb[12].mxu1 }
 0x75e   : >> { %v1176_v23 = vadd.f32 %v1979_v3, %v1170_v21  ;;  %v1760_v24 = vpop.f32.mrb[13].mxu1  ;;  %v1901_v21 = vld [vmem:[%s2431_s15] sm:$0xff] (%p526_p11)  }
 0x75f   : >> { %v1173_v25 = vpop.f32.mrb[14].mxu1 }
 0x760   : >> { %v2302_v26 = vadd.f32 %v1629_v22, %v1176_v23  ;;  %v1761_v27 = vpop.f32.mrb[15].mxu1  ;;  %v1995_v22 = vmov (%p526_p11), 0.0  }
 0x761   : > { %1790 = vmatprep.subr.bf16.mxu0 (%p526_p11), %v1995_v22 }
 0x762   : >> { %v1190_v28 = vsel %vm535_vm1, %v2302_v26, 0.0 }
 0x763   : >> { %1191 = vadd.xlane.f32.xlu1 %v1190_v28  ;;  %v1649_v28 = vld [vmem:[%s2430_s14] ss:$0 sm:$0xff] (%p526_p11) }
 0x7f0   : >> { %v1192_v29 = vpop.xlane.xlu1 %1191 }
 0x7f1   : >> { %v1193_v30 = vmul.f32 0.03125, %v1192_v29 }
 0x7f3   : >> { %v1194_v32 = vsub.f32 %v2302_v26, %v1193_v30 }
 0x7f5   : >> { %v1195_v34 = vmul.f32 %v1194_v32, %v1194_v32 }
 0x7f7   : >> { %v1196_v3 = vsel %vm535_vm1, %v1195_v34, 0.0 }
 0x7f8   : >> { %1197 = vadd.xlane.f32.xlu0 %v1196_v3 }
 0x885   : >> { %v1198_v39 = vpop.xlane.xlu0 %1197 }
 0x886   : >> { %v1199_v40 = vmul.f32 0.03125, %v1198_v39 }
 0x888   : >> { %v1200_v41 = vadd.f32 1e-05, %v1199_v40 }
 0x88a   : >> { %1897 = vrsqrt.f32 %v1200_v41 }
 0x894   : >> { %v1898_v42 = vpop.eup %1897 }
 0x895   : >> { %v1202_v43 = vmul.f32 %v1898_v42, %v1194_v32 }
 0x897   : >> { %v1209_v31 = vmul.f32 %v1630_v33, %v1202_v43 }
 0x899   : >> { %v1216_v44 = vadd.f32 %v1631_v36, %v1209_v31 }
 0x89b   : >> { %v1223_v45 = vpack.c.bf16 %v1216_v44, %v1216_v44 }
 0x89d   : >> { %1767 = vmatmul.mubr.msk.bf16.vlgmr.msra.gmra.mrb[24].mxu0 %vm535_vm1, %v1223_v45 }
 0x89e   : > { %1794 = vmatprep.mubr.msk.bf16.mxu0 (%p526_p11), %vm1996_vm7, %v1995_v22  ;;  %1791 = vmatpush3.bf16.msra.mxu0 (%p526_p11), %v1901_v21 }
 0x89f   : > { %1792 = vmatprep.subr.bf16.mxu0 (%p526_p11), %v1995_v22 }
 0x8a2   : > { %1793 = vmatpush3.bf16.msra.mxu0 (%p526_p11), %v1902_v1 }
 0x970   : >> { %v1281_v54 = vpop.f32.mrb[24].mxu0 }
 0x971   : >> { %v1282_v55 = vadd.f32 %v1633_v53, %v1281_v54  ;;  %v1768_v56 = vpop.f32.mrb[25].mxu0 }
 0x972   : >> { %v1284_v57 = vpop.f32.mrb[26].mxu0 }
 0x973   : >> { %v1288_v58 = vmul.f32 0.044715, %v1282_v55  ;;  %v1769_v59 = vpop.f32.mrb[27].mxu0  ;;  %v1287_v10 = vmul.f32 0.5, %v1282_v55 }
 0x975   : >> { %v1289_v60 = vmul.f32 %v1288_v58, %v1282_v55 }
 0x977   : >> { %v1290_v61 = vmul.f32 %v1289_v60, %v1282_v55 }
 0x979   : >> { %v1291_v62 = vadd.f32 %v1290_v61, %v1282_v55 }
 0x97b   : >> { %v1292_v63 = vmul.f32 0.7978846, %v1291_v62 }
 0x97d   : >> { %1899 = vtanh.f32 %v1292_v63 }
 0x987   : >> { %v1900_v0 = vpop.eup %1899 }
 0x988   : >> { %v1294_v4 = vadd.f32 1.0, %v1900_v0 }
 0x98a   : >> { %v1295_v5 = vmul.f32 %v1294_v4, %v1287_v10 }
 0x98c   : >> { %v1315_v6 = vpack.c.bf16 %v1295_v5, %v1295_v5 }
 0x98e   : >> { %1787 = vmatmul.mubr.bf16.vlgmr.msra.gmra.mrb[16].mxu1 %v1315_v6 }
 0xa60   : > { %528 = sbr.rel (!%p526_p11) target bundleno = 34 (0x22), region = 138 }
 0xa61   : >> { %v1398_v7 = vpop.f32.mrb[16].mxu1 }
 0xa62   : >> { %v1404_v9 = vadd.f32 %v1398_v7, %v2302_v26  ;;  %v1788_v11 = vpop.f32.mrb[17].mxu1  ;;  %v1648_v26 = vld [vmem:[%s2429_s13] ss:$0 sm:$0xff] (%p526_p11) }
 0xa63   : >> { %v1401_v12 = vpop.f32.mrb[18].mxu1 }
 0xa64   : >> { %v1413_v13 = vadd.f32 %v1647_v8, %v1404_v9   ;;  %v1789_v14 = vpop.f32.mrb[19].mxu1 }
 0xa66   : >> { %v2454_v3 = vmov %v1413_v13  ;;  %v1417_v15 = vsel (%p526_p11), %vm535_vm1, %v1413_v13, 0.0 }
 0xa67   : > { %1418 = vadd.xlane.f32.xlu0 %v1417_v15 }
 0xaf4   : > { %v1419_v16 = vpop.xlane.xlu0 %1418 }
 0xaf5   : > { %v1421_v17 = vmul.f32 0.03125, %v1419_v16 }
 0xaf7   : > { %v1422_v18 = vsub.f32 %v1413_v13, %v1421_v17 }
 0xaf9   : > { %v1423_v19 = vmul.f32 %v1422_v18, %v1422_v18 }
 0xafb   : > { %v1424_v20 = vsel %vm535_vm1, %v1423_v19, 0.0 }
 0xafc   : > { %1425 = vadd.xlane.f32.xlu0 %v1424_v20 }
 0xb89   : > { %v1426_v2 = vpop.xlane.xlu0 %1425 }
 0xb8a   : > { %v1427_v23 = vmul.f32 0.03125, %v1426_v2 }
 0xb8c   : > { %v1428_v24 = vadd.f32 1e-05, %v1427_v23 }
 0xb8e   : > { %1903 = vrsqrt.f32 %v1428_v24 }
 0xb98   : > { %v1904_v25 = vpop.eup %1903 }
 0xb99   : > { %v1430_v27 = vmul.f32 %v1904_v25, %v1422_v18 }
 0xb9b   : > { %v1437_v29 = vmul.f32 %v1648_v26, %v1430_v27 }
 0xb9d   : > { %v1444_v30 = vadd.f32 %v1649_v28, %v1437_v29 }
 0xb9f   : > { %v1449_v32 = vpack.c.bf16 %v1444_v30, %v1444_v30 }
 0xba1   : > { %1795 = vmatmul.mubr.msk.bf16.vlgmr.msra.gmra.mrb[0].mxu0 %vm535_vm1, %v1449_v32 }
 0xc74   : > { %v1499_v34 = vpop.f32.mrb[0].mxu0 }
 0xc75   : > { %1505 = vst [vmem:[%s2457_s18] sm:$0xff] %v1499_v34  ;;  %v1796_v3 = vpop.f32.mrb[1].mxu0 }
 0xc76   : > { %v1502_v35 = vpop.f32.mrb[2].mxu0 }
 0xc77   : > { %1918 = shalt.err (!%p1915_p4)
}
 0xc78   : > { %s1919_s19 = scalar_lea.hbm %s2370_s21, 128  ;;  %s1923_s20 = scalar_lea.hbm %s2456_s28, 256 }
 0xc79   : > { %p1920_p7 = scmp.ne.s32.totalorder %s2370_s21, %s1919_s19  ;;  %p1924_p10 = scmp.lt.u32.totalorder %s2370_s21, %s2456_s28 }
 0xc7a   : > { %p1925_p11 = scmp.lt.u32.totalorder %s1923_s20, %s1919_s19  ;;  %p1927_p13 = scmp.lt.u32.totalorder %s1919_s19, %s2370_s21 }
 0xc7b   : > { %p1921_p8 = pnand %p1920_p7, %p2121_p5 }
 0xc7c   : > { %p1926_p12 = por %p1925_p11, %p1924_p10 }
 0xc7d   : > { %p1922_p9 = pneg %p1921_p8 }
 0xc7e   : > { %p1928_p0 = por %p1927_p13, %p1926_p12 }
 0xc80   : > { %p1929_p1 = pnand %p1928_p0, %p1922_p9 }
 0xc82   : > { %1932 = shalt.err (!%p1929_p1)
}
 0xc83   : > { %1798 = dma.vmem_to_hbm [thread:$0]  (%p2121_p5), %s2372_s3, 128, %s2370_s21, %s1507_s23   ;;  %v1797_v37 = vpop.f32.mrb[3].mxu0 }
 0xc84 PF: > { %s2459_s24 = sld [smem:[#allocation7_spill]]  ;;  %s2460_s25 = sld [smem:[#allocation5_spill]] }
 0xc8a   : > { %p1804_p2 = scmp.ge.s32.totalorder %s2459_s24, 2  ;;  %s1532_s16 = sand.u32 1, %s2460_s25  }
 0xc8b   : > { %s1533_s17 = scalar_lea.sflag [#allocation3], %s1532_s16 }
 0xc8c   : > { %p1801_p3 = pnand %p1804_p2, %p2125_p6 }
 0xc8e   : > { %1958 = dma.done.wait (!%p1801_p3), %s1533_s17, 128  }
 0xc8f   : > { %1960 = vsyncadd (!%p1801_p3), %s1533_s17, 4294967168  ;;  %s2462_s24 = sld [smem:[#allocation8_spill]]  ;;  %s2463_s19 = sld [smem:[#allocation6_spill]] }
 0xc90   : > { %s2464_s23 = sld [smem:[#allocation9_spill]]  ;;  %s2465_s21 = smov %s1967_s22 }
 0xc95   : > { %p26_p4 = scmp.ge.s32.totalorder %s2462_s24, 4   ;;  %s2466_s22 = smov %s2463_s19 }
 0xc97   :  { %28 = sbr.rel (!%p26_p4) target bundleno = 7 (0x7), region = 149 }
 0xc9e   :  { %1538 = vsyncpa [#allocation3], 1 }
 0xc9f   :  { %1540 = vsyncpa [#allocation3 + $0x1], 1 }

</bundles_post_ra>
